<compile_context>
chip_gen: v7x
topology: tpu7x:2x2x1
jax: 0.10.0
libtpu: 0.0.40
codegen_flags: <defaults>
</compile_context>

<pallas_src>
import jax
import jax.numpy as jnp
from jax.experimental import pallas as pl
from jax.experimental.pallas import tpu as pltpu

NUM_STATE = 32
NUM_FEAT = 64
NUM_ACTIONS = 156
NUM_ACTIONS_PAD = 256          # lane-dense (multiple of 128 / one 256-wide MXU N)
BN_EPS = 1e-5
MAX_TB = 512                   # batch tile (rows per grid step)


def _round_up(x, m):
    return (x + m - 1) // m * m


def _dqn_kernel(obs_ref, emb_ref,
                w1_ref, c1_ref,
                w2_ref, c2_ref,
                w3_ref, c3_ref,
                w4_ref, b4_ref,
                out_ref):
    """One batch tile: fused embedding-select + 3x(matmul+shift+ReLU) + matmul."""
    obs = obs_ref[...]                        # [TB, 1 + NUM_STATE] f32
    stage = obs[:, 0:1]                       # [TB, 1], values in {0, 1, 2}
    state = obs[:, 1:]                        # [TB, NUM_STATE]

    emb = emb_ref[...]                        # [3, NUM_STATE] f32
    row0 = emb[0:1, :]
    row1 = emb[1:2, :]
    row2 = emb[2:3, :]
    # 3-row "gather" as two selects (VPU filler; kernel is MXU/overhead-bound).
    emb_stage = jnp.where(stage >= 1.5, row2,
                          jnp.where(stage >= 0.5, row1, row0))
    x = state + emb_stage                     # [TB, NUM_STATE] f32

    # Layer 1: Linear + folded BN + ReLU
    h = jnp.dot(x.astype(jnp.bfloat16), w1_ref[...],
                preferred_element_type=jnp.float32)
    h = jnp.maximum(h + c1_ref[...], 0.0)

    # Layer 2
    h = jnp.dot(h.astype(jnp.bfloat16), w2_ref[...],
                preferred_element_type=jnp.float32)
    h = jnp.maximum(h + c2_ref[...], 0.0)

    # Layer 3
    h = jnp.dot(h.astype(jnp.bfloat16), w3_ref[...],
                preferred_element_type=jnp.float32)
    h = jnp.maximum(h + c3_ref[...], 0.0)

    # Last layer (padded to 256 lanes, unmasked vst)
    h = jnp.dot(h.astype(jnp.bfloat16), w4_ref[...],
                preferred_element_type=jnp.float32)
    out_ref[...] = h + b4_ref[...]


def _fold_bn_into_weight(w, bias, gamma, beta, running_mean, running_var):
    """Fold Linear bias + eval-mode BatchNorm1d into weight columns + shift."""
    inv_std = 1.0 / jnp.sqrt(running_var + BN_EPS)
    scale = gamma * inv_std                          # [F_out]
    shift = beta + (bias - running_mean) * scale     # [F_out]
    w_folded = w * scale[None, :]                    # scale folded into columns
    return w_folded, shift[None, :]                  # shift kept f32 [1, F_out]


def init_params(key, num_state=NUM_STATE, num_actions=NUM_ACTIONS,
                num_feat=NUM_FEAT):
    """Parameters mirroring SimpleDQN.__init__/_weight_init (eval mode), folded."""
    ks = jax.random.split(key, 10)

    def kaiming_t(k, fan_in, fan_out):
        std = jnp.sqrt(2.0 / fan_in)
        # PyTorch Linear weight is [out, in]; store transposed [in, out].
        return (jax.random.normal(k, (fan_out, fan_in), jnp.float32) * std).T

    params = {"embedding": jax.random.normal(ks[0], (3, num_state), jnp.float32)}

    dims = [num_state, num_feat, 2 * num_feat, 4 * num_feat]
    for i in range(3):
        fin, fout = dims[i], dims[i + 1]
        kw, kb, kg, kbe, km, kv = jax.random.split(ks[1 + i], 6)
        w = kaiming_t(kw, fin, fout)
        bias = 0.05 * jax.random.normal(kb, (fout,), jnp.float32)
        gamma = 1.0 + 0.1 * jax.random.normal(kg, (fout,), jnp.float32)
        beta = 0.1 * jax.random.normal(kbe, (fout,), jnp.float32)
        rmean = 0.1 * jax.random.normal(km, (fout,), jnp.float32)
        rvar = jnp.abs(jax.random.normal(kv, (fout,), jnp.float32)) + 0.5
        w_f, shift = _fold_bn_into_weight(w, bias, gamma, beta, rmean, rvar)
        params[f"w{i + 1}"] = w_f.astype(jnp.bfloat16)   # bf16 MXU weights
        params[f"shift{i + 1}"] = shift                  # f32 [1, fout]

    # Last layer, zero-padded to a lane-dense 256-wide output.
    w4 = kaiming_t(ks[4], 4 * num_feat, num_actions)     # [256, 156]
    b4 = 0.05 * jax.random.normal(ks[5], (num_actions,), jnp.float32)
    w4p = jnp.zeros((4 * num_feat, NUM_ACTIONS_PAD), jnp.float32)
    w4p = w4p.at[:, :num_actions].set(w4)
    b4p = jnp.zeros((1, NUM_ACTIONS_PAD), jnp.float32)
    b4p = b4p.at[:, :num_actions].set(b4)
    params["w4"] = w4p.astype(jnp.bfloat16)
    params["b4"] = b4p
    return params


@jax.jit
def simple_dqn_forward(obs, params):
    """obs: [B, 1 + NUM_STATE] f32 (col 0 = stage id in {0,1,2}) -> [B, NUM_ACTIONS]."""
    B = obs.shape[0]
    TB = min(MAX_TB, _round_up(B, 8))        # batch tile, multiple of 8 sublanes
    Bp = _round_up(B, TB)
    obs_p = jnp.pad(obs, ((0, Bp - B), (0, 0))) if Bp != B else obs

    grid = (Bp // TB,)

    ins = (
        obs_p,
        params["embedding"],
        params["w1"], params["shift1"],
        params["w2"], params["shift2"],
        params["w3"], params["shift3"],
        params["w4"], params["b4"],
    )
    in_specs = (
        [pl.BlockSpec((TB, 1 + NUM_STATE), lambda i: (i, 0))] +      # batch-tiled
        [pl.BlockSpec(a.shape, lambda i: (0, 0)) for a in ins[1:]]   # resident weights
    )

    flops = 2 * Bp * (NUM_STATE * NUM_FEAT
                      + NUM_FEAT * 2 * NUM_FEAT
                      + 2 * NUM_FEAT * 4 * NUM_FEAT
                      + 4 * NUM_FEAT * NUM_ACTIONS_PAD)
    bytes_weights = sum(int(a.size) * a.dtype.itemsize for a in ins[1:])
    bytes_accessed = int(obs_p.size) * 4 + Bp * NUM_ACTIONS_PAD * 4 + bytes_weights

    out_padded = pl.pallas_call(
        _dqn_kernel,
        out_shape=jax.ShapeDtypeStruct((Bp, NUM_ACTIONS_PAD), jnp.float32),
        grid=grid,
        in_specs=in_specs,
        out_specs=pl.BlockSpec((TB, NUM_ACTIONS_PAD), lambda i: (i, 0)),
        compiler_params=pltpu.CompilerParams(
            dimension_semantics=("parallel",)),
        cost_estimate=pl.CostEstimate(
            flops=flops, transcendentals=0, bytes_accessed=bytes_accessed),
    )(*ins)

    return out_padded[:B, :NUM_ACTIONS]


def _reference_forward(obs, params):
    """Pure-JAX reference mirroring the kernel math (same folded bf16 weights)."""
    stage = obs[:, 0].astype(jnp.int32)
    state = obs[:, 1:]
    h = state + params["embedding"][stage]
    for i in range(1, 4):
        h = jnp.dot(h.astype(jnp.bfloat16), params[f"w{i}"],
                    preferred_element_type=jnp.float32)
        h = jnp.maximum(h + params[f"shift{i}"], 0.0)
    h = jnp.dot(h.astype(jnp.bfloat16), params["w4"],
                preferred_element_type=jnp.float32)
    return (h + params["b4"])[:, :NUM_ACTIONS]


if __name__ == "__main__":
    key = jax.random.PRNGKey(0)
    k_param, k_stage, k_state, k_stage2, k_state2 = jax.random.split(key, 5)

    params = init_params(k_param)

    # Small inference-shaped batch.
    B = 8
    stage = jax.random.randint(k_stage, (B, 1), 0, 3).astype(jnp.float32)
    state = jax.random.normal(k_state, (B, NUM_STATE), jnp.float32)
    obs = jnp.concatenate([stage, state], axis=1)          # [B, 1 + NUM_STATE]

    out = jax.block_until_ready(simple_dqn_forward(obs, params))
    ref = _reference_forward(obs, params)
    assert out.shape == (B, NUM_ACTIONS)
    assert jnp.allclose(out, ref, atol=1e-2, rtol=1e-2), "mismatch vs JAX reference (B=8)"

    # Larger batch to exercise the multi-step grid and batch padding path.
    B2 = 777
    stage2 = jax.random.randint(k_stage2, (B2, 1), 0, 3).astype(jnp.float32)
    state2 = jax.random.normal(k_state2, (B2, NUM_STATE), jnp.float32)
    obs2 = jnp.concatenate([stage2, state2], axis=1)
    out2 = jax.block_until_ready(simple_dqn_forward(obs2, params))
    ref2 = _reference_forward(obs2, params)
    assert out2.shape == (B2, NUM_ACTIONS)
    assert jnp.allclose(out2, ref2, atol=1e-2, rtol=1e-2), "mismatch vs JAX reference (B=777)"

    print("KERNEL_OK")
</pallas_src>

<mosaic_0001>
module attributes {stable_mosaic.version = 11 : i64} {
  func.func @_dqn_kernel(%arg0: i32, %arg1: memref<8x33xf32, #tpu.memory_space<vmem>>, %arg2: memref<3x32xf32, #tpu.memory_space<vmem>>, %arg3: memref<32x64xbf16, #tpu.memory_space<vmem>>, %arg4: memref<1x64xf32, #tpu.memory_space<vmem>>, %arg5: memref<64x128xbf16, #tpu.memory_space<vmem>>, %arg6: memref<1x128xf32, #tpu.memory_space<vmem>>, %arg7: memref<128x256xbf16, #tpu.memory_space<vmem>>, %arg8: memref<1x256xf32, #tpu.memory_space<vmem>>, %arg9: memref<256x256xbf16, #tpu.memory_space<vmem>>, %arg10: memref<1x256xf32, #tpu.memory_space<vmem>>, %arg11: memref<8x256xf32, #tpu.memory_space<vmem>>) attributes {dimension_semantics = [#tpu.dimension_semantics<parallel>], iteration_bounds = array<i64: 1>, scalar_prefetch = 0 : i64, scratch_operands = 0 : i64, tpu.core_type = #tpu.core_type<tc>, window_params = [{transform_indices = @transform_0, window_bounds = array<i64: 8, 33>}, {pipeline_mode = #tpu.pipeline_mode<synchronous>, transform_indices = @transform_1, window_bounds = array<i64: 3, 32>}, {pipeline_mode = #tpu.pipeline_mode<synchronous>, transform_indices = @transform_2, window_bounds = array<i64: 32, 64>}, {pipeline_mode = #tpu.pipeline_mode<synchronous>, transform_indices = @transform_3, window_bounds = array<i64: 1, 64>}, {pipeline_mode = #tpu.pipeline_mode<synchronous>, transform_indices = @transform_4, window_bounds = array<i64: 64, 128>}, {pipeline_mode = #tpu.pipeline_mode<synchronous>, transform_indices = @transform_5, window_bounds = array<i64: 1, 128>}, {pipeline_mode = #tpu.pipeline_mode<synchronous>, transform_indices = @transform_6, window_bounds = array<i64: 128, 256>}, {pipeline_mode = #tpu.pipeline_mode<synchronous>, transform_indices = @transform_7, window_bounds = array<i64: 1, 256>}, {pipeline_mode = #tpu.pipeline_mode<synchronous>, transform_indices = @transform_8, window_bounds = array<i64: 256, 256>}, {pipeline_mode = #tpu.pipeline_mode<synchronous>, transform_indices = @transform_9, window_bounds = array<i64: 1, 256>}, {transform_indices = @transform_10, window_bounds = array<i64: 8, 256>}]} {
    %c0 = arith.constant 0 : index
    %c0_0 = arith.constant 0 : index
    %0 = vector.load %arg1[%c0, %c0_0] : memref<8x33xf32, #tpu.memory_space<vmem>>, vector<8x33xf32>
    %1 = vector.extract_strided_slice %0 {offsets = [0, 0], sizes = [8, 1], strides = [1, 1]} : vector<8x33xf32> to vector<8x1xf32>
    %2 = vector.extract_strided_slice %0 {offsets = [0, 1], sizes = [8, 32], strides = [1, 1]} : vector<8x33xf32> to vector<8x32xf32>
    %c0_1 = arith.constant 0 : index
    %c0_2 = arith.constant 0 : index
    %3 = vector.load %arg2[%c0_1, %c0_2] : memref<3x32xf32, #tpu.memory_space<vmem>>, vector<3x32xf32>
    %4 = vector.extract_strided_slice %3 {offsets = [0, 0], sizes = [1, 32], strides = [1, 1]} : vector<3x32xf32> to vector<1x32xf32>
    %5 = vector.extract_strided_slice %3 {offsets = [1, 0], sizes = [1, 32], strides = [1, 1]} : vector<3x32xf32> to vector<1x32xf32>
    %6 = vector.extract_strided_slice %3 {offsets = [2, 0], sizes = [1, 32], strides = [1, 1]} : vector<3x32xf32> to vector<1x32xf32>
    %cst = arith.constant 1.500000e+00 : f32
    %7 = vector.broadcast %cst : f32 to vector<8x1xf32>
    %8 = arith.cmpf oge, %1, %7 : vector<8x1xf32>
    %cst_3 = arith.constant 5.000000e-01 : f32
    %9 = vector.broadcast %cst_3 : f32 to vector<8x1xf32>
    %10 = arith.cmpf oge, %1, %9 : vector<8x1xf32>
    %11 = vector.shape_cast %10 : vector<8x1xi1> to vector<8x1xi1>
    %12 = vector.broadcast %11 : vector<8x1xi1> to vector<8x32xi1>
    %13 = vector.shape_cast %5 : vector<1x32xf32> to vector<1x32xf32>
    %14 = vector.broadcast %13 : vector<1x32xf32> to vector<8x32xf32>
    %15 = vector.shape_cast %4 : vector<1x32xf32> to vector<1x32xf32>
    %16 = vector.broadcast %15 : vector<1x32xf32> to vector<8x32xf32>
    %17 = arith.select %12, %14, %16 : vector<8x32xi1>, vector<8x32xf32>
    %18 = vector.shape_cast %8 : vector<8x1xi1> to vector<8x1xi1>
    %19 = vector.broadcast %18 : vector<8x1xi1> to vector<8x32xi1>
    %20 = vector.shape_cast %6 : vector<1x32xf32> to vector<1x32xf32>
    %21 = vector.broadcast %20 : vector<1x32xf32> to vector<8x32xf32>
    %22 = arith.select %19, %21, %17 : vector<8x32xi1>, vector<8x32xf32>
    %23 = arith.addf %2, %22 : vector<8x32xf32>
    %24 = arith.truncf %23 : vector<8x32xf32> to vector<8x32xbf16>
    %c0_4 = arith.constant 0 : index
    %c0_5 = arith.constant 0 : index
    %25 = vector.load %arg3[%c0_4, %c0_5] : memref<32x64xbf16, #tpu.memory_space<vmem>>, vector<32x64xbf16>
    %cst_6 = arith.constant dense<0.000000e+00> : vector<8x64xf32>
    %26 = tpu.matmul %24, %25, %cst_6 {dimension_numbers = #tpu.dot_dimension_numbers<[1], [0], [0], [1], [0, 0, 1, 1], [], []>} : vector<8x32xbf16>, vector<32x64xbf16>, vector<8x64xf32> -> vector<8x64xf32>
    %c0_7 = arith.constant 0 : index
    %c0_8 = arith.constant 0 : index
    %27 = vector.load %arg4[%c0_7, %c0_8] : memref<1x64xf32, #tpu.memory_space<vmem>>, vector<1x64xf32>
    %28 = vector.broadcast %27 : vector<1x64xf32> to vector<8x64xf32>
    %29 = arith.addf %26, %28 : vector<8x64xf32>
    %cst_9 = arith.constant 0.000000e+00 : f32
    %30 = vector.broadcast %cst_9 : f32 to vector<8x64xf32>
    %31 = arith.maximumf %29, %30 : vector<8x64xf32>
    %32 = arith.truncf %31 : vector<8x64xf32> to vector<8x64xbf16>
    %c0_10 = arith.constant 0 : index
    %c0_11 = arith.constant 0 : index
    %33 = vector.load %arg5[%c0_10, %c0_11] : memref<64x128xbf16, #tpu.memory_space<vmem>>, vector<64x128xbf16>
    %cst_12 = arith.constant dense<0.000000e+00> : vector<8x128xf32>
    %34 = tpu.matmul %32, %33, %cst_12 {dimension_numbers = #tpu.dot_dimension_numbers<[1], [0], [0], [1], [0, 0, 1, 1], [], []>} : vector<8x64xbf16>, vector<64x128xbf16>, vector<8x128xf32> -> vector<8x128xf32>
    %c0_13 = arith.constant 0 : index
    %c0_14 = arith.constant 0 : index
    %35 = vector.load %arg6[%c0_13, %c0_14] : memref<1x128xf32, #tpu.memory_space<vmem>>, vector<1x128xf32>
    %36 = vector.broadcast %35 : vector<1x128xf32> to vector<8x128xf32>
    %37 = arith.addf %34, %36 : vector<8x128xf32>
    %cst_15 = arith.constant 0.000000e+00 : f32
    %38 = vector.broadcast %cst_15 : f32 to vector<8x128xf32>
    %39 = arith.maximumf %37, %38 : vector<8x128xf32>
    %40 = arith.truncf %39 : vector<8x128xf32> to vector<8x128xbf16>
    %c0_16 = arith.constant 0 : index
    %c0_17 = arith.constant 0 : index
    %41 = vector.load %arg7[%c0_16, %c0_17] : memref<128x256xbf16, #tpu.memory_space<vmem>>, vector<128x256xbf16>
    %cst_18 = arith.constant dense<0.000000e+00> : vector<8x256xf32>
    %42 = tpu.matmul %40, %41, %cst_18 {dimension_numbers = #tpu.dot_dimension_numbers<[1], [0], [0], [1], [0, 0, 1, 1], [], []>} : vector<8x128xbf16>, vector<128x256xbf16>, vector<8x256xf32> -> vector<8x256xf32>
    %c0_19 = arith.constant 0 : index
    %c0_20 = arith.constant 0 : index
    %43 = vector.load %arg8[%c0_19, %c0_20] : memref<1x256xf32, #tpu.memory_space<vmem>>, vector<1x256xf32>
    %44 = vector.broadcast %43 : vector<1x256xf32> to vector<8x256xf32>
    %45 = arith.addf %42, %44 : vector<8x256xf32>
    %cst_21 = arith.constant 0.000000e+00 : f32
    %46 = vector.broadcast %cst_21 : f32 to vector<8x256xf32>
    %47 = arith.maximumf %45, %46 : vector<8x256xf32>
    %48 = arith.truncf %47 : vector<8x256xf32> to vector<8x256xbf16>
    %c0_22 = arith.constant 0 : index
    %c0_23 = arith.constant 0 : index
    %49 = vector.load %arg9[%c0_22, %c0_23] : memref<256x256xbf16, #tpu.memory_space<vmem>>, vector<256x256xbf16>
    %cst_24 = arith.constant dense<0.000000e+00> : vector<8x256xf32>
    %50 = tpu.matmul %48, %49, %cst_24 {dimension_numbers = #tpu.dot_dimension_numbers<[1], [0], [0], [1], [0, 0, 1, 1], [], []>} : vector<8x256xbf16>, vector<256x256xbf16>, vector<8x256xf32> -> vector<8x256xf32>
    %c0_25 = arith.constant 0 : index
    %c0_26 = arith.constant 0 : index
    %51 = vector.load %arg10[%c0_25, %c0_26] : memref<1x256xf32, #tpu.memory_space<vmem>>, vector<1x256xf32>
    %52 = vector.broadcast %51 : vector<1x256xf32> to vector<8x256xf32>
    %53 = arith.addf %50, %52 : vector<8x256xf32>
    %c0_27 = arith.constant 0 : index
    %c0_28 = arith.constant 0 : index
    %54 = vector.load %arg11[%c0_27, %c0_28] : memref<8x256xf32, #tpu.memory_space<vmem>>, vector<8x256xf32>
    tpu.vector_store %arg11[%c0_27, %c0_28], %53 {strides = array<i32>} : memref<8x256xf32, #tpu.memory_space<vmem>>, vector<8x256xf32>,
    return
  }
  func.func @transform_0(%arg0: i32) -> (i32, i32) {
    %c0_i32 = arith.constant 0 : i32
    %c0_i32_0 = arith.constant 0 : i32
    return %arg0, %c0_i32 : i32, i32
  }
  func.func @transform_1(%arg0: i32) -> (i32, i32) {
    %c0_i32 = arith.constant 0 : i32
    %c0_i32_0 = arith.constant 0 : i32
    %c0_i32_1 = arith.constant 0 : i32
    return %c0_i32, %c0_i32_0 : i32, i32
  }
  func.func @transform_2(%arg0: i32) -> (i32, i32) {
    %c0_i32 = arith.constant 0 : i32
    %c0_i32_0 = arith.constant 0 : i32
    %c0_i32_1 = arith.constant 0 : i32
    return %c0_i32, %c0_i32_0 : i32, i32
  }
  func.func @transform_3(%arg0: i32) -> (i32, i32) {
    %c0_i32 = arith.constant 0 : i32
    %c0_i32_0 = arith.constant 0 : i32
    %c0_i32_1 = arith.constant 0 : i32
    return %c0_i32, %c0_i32_0 : i32, i32
  }
  func.func @transform_4(%arg0: i32) -> (i32, i32) {
    %c0_i32 = arith.constant 0 : i32
    %c0_i32_0 = arith.constant 0 : i32
    %c0_i32_1 = arith.constant 0 : i32
    return %c0_i32, %c0_i32_0 : i32, i32
  }
  func.func @transform_5(%arg0: i32) -> (i32, i32) {
    %c0_i32 = arith.constant 0 : i32
    %c0_i32_0 = arith.constant 0 : i32
    %c0_i32_1 = arith.constant 0 : i32
    return %c0_i32, %c0_i32_0 : i32, i32
  }
  func.func @transform_6(%arg0: i32) -> (i32, i32) {
    %c0_i32 = arith.constant 0 : i32
    %c0_i32_0 = arith.constant 0 : i32
    %c0_i32_1 = arith.constant 0 : i32
    return %c0_i32, %c0_i32_0 : i32, i32
  }
  func.func @transform_7(%arg0: i32) -> (i32, i32) {
    %c0_i32 = arith.constant 0 : i32
    %c0_i32_0 = arith.constant 0 : i32
    %c0_i32_1 = arith.constant 0 : i32
    return %c0_i32, %c0_i32_0 : i32, i32
  }
  func.func @transform_8(%arg0: i32) -> (i32, i32) {
    %c0_i32 = arith.constant 0 : i32
    %c0_i32_0 = arith.constant 0 : i32
    %c0_i32_1 = arith.constant 0 : i32
    return %c0_i32, %c0_i32_0 : i32, i32
  }
  func.func @transform_9(%arg0: i32) -> (i32, i32) {
    %c0_i32 = arith.constant 0 : i32
    %c0_i32_0 = arith.constant 0 : i32
    %c0_i32_1 = arith.constant 0 : i32
    return %c0_i32, %c0_i32_0 : i32, i32
  }
  func.func @transform_10(%arg0: i32) -> (i32, i32) {
    %c0_i32 = arith.constant 0 : i32
    %c0_i32_0 = arith.constant 0 : i32
    return %arg0, %c0_i32 : i32, i32
  }
}

</mosaic_0001>

<bundles_post_ra>
// kernel: simple_dqn_forward.1
= control target key start
LH: loop header
LB: loop body
LE: loop exit
PB: predicated region body
PF: predicated region fallthrough
CT: control target
= control target key end

     0   :  { %15 = vsyncpa [#allocation3], 0  ;;  %s1303_s0 = inlined_call_operand.hbm [shape: f32[8,33], index: 0, kind: input, shape index: {}]   ;;  %s1304_s1 = inlined_call_operand.vmem [shape: f32[3,32], index: 1, kind: input, shape index: {}]   ;;  %s1305_s2 = inlined_call_operand.vmem [shape: bf16[32,64], index: 2, kind: input, shape index: {}]   ;;  %s1306_s3 = inlined_call_operand.hbm [shape: f32[1,64], index: 3, kind: input, shape index: {}]   ;;  %s1307_s4 = inlined_call_operand.hbm [shape: bf16[64,128], index: 4, kind: input, shape index: {}]   ;;  %s1308_s5 = inlined_call_operand.hbm [shape: f32[1,128], index: 5, kind: input, shape index: {}]   ;;  %s1309_s6 = inlined_call_operand.hbm [shape: bf16[128,256], index: 6, kind: input, shape index: {}]   ;;  %s1310_s7 = inlined_call_operand.vmem [shape: f32[1,256], index: 7, kind: input, shape index: {}]   ;;  %s1311_s8 = inlined_call_operand.hbm [shape: bf16[256,256], index: 8, kind: input, shape index: {}]   ;;  %s1312_s9 = inlined_call_operand.hbm [shape: f32[1,256], index: 9, kind: input, shape index: {}]   ;;  %s1313_s10 = inlined_call_operand.hbm [shape: f32[8,256], index: 10, kind: output, shape index: {}]  }
   0x1   :  { %16 = vsyncpa [#allocation6], 0 }
   0x2   :  { %17 = vsyncpa [#allocation9], 0 }
   0x3   :  { %18 = vsyncpa [#allocation12], 0 }
   0x4   :  { %19 = vsyncpa [#allocation4], 0  ;;  %s1101_s13 = smov [#allocation5]   ;;  %s1102_s15 = smov [#allocation8]  }
   0x5   :  { %s40_s14 = sshll.u32 %s1101_s13, 4  ;;  %s62_s16 = sshll.u32 %s1102_s15, 4  ;;  %s41_s14 = int_to_ptr.vmem [resolvable:$true] %s40_s14  ;;  %s63_s16 = int_to_ptr.vmem [resolvable:$true] %s62_s16 }
   0x6   :  { %s915_s19 = scalar_lea.hbm %s1306_s3, 16 }
   0x7   :  { %p916_p0 = scmp.ne.s32.totalorder %s1306_s3, %s915_s19  ;;  %p919_p1 = scmp.lt.u32.totalorder %s915_s19, %s1306_s3 }
   0x9   :  { %p921_p2 = pnand %p919_p1, %p916_p0 }
   0xb   :  { %924 = shalt.err (!%p921_p2)
}
   0xc   :  { %s925_s24 = scalar_lea.vmem %s41_s14, 16  ;;  %s929_s25 = scalar_lea.vmem %s41_s14, 32 }
   0xd   :  { %p926_p3 = scmp.ne.s32.totalorder %s41_s14, %s925_s24  ;;  %p930_p4 = scmp.lt.s32.totalorder %s41_s14, %s41_s14 }
   0xe   :  { %p931_p5 = scmp.lt.s32.totalorder %s929_s25, %s925_s24 }
  0x10   :  { %p932_p6 = por %p931_p5, %p930_p4 }
  0x12   :  { %p933_p7 = pnand %p932_p6, %p926_p3 }
  0x14   :  { %936 = shalt.err (!%p933_p7)
}
  0x15   :  { %43 = dma.hbm_to_vmem [thread:$0]  %s1306_s3, 16, %s41_s14, [#allocation6]  }
  0x16   :  { %s937_s30 = scalar_lea.hbm %s1308_s5, 16 }
  0x17   :  { %p938_p8 = scmp.ne.s32.totalorder %s1308_s5, %s937_s30  ;;  %p941_p9 = scmp.lt.u32.totalorder %s937_s30, %s1308_s5 }
  0x19   :  { %p943_p10 = pnand %p941_p9, %p938_p8 }
  0x1b   :  { %946 = shalt.err (!%p943_p10)
}
  0x1c   :  { %s947_s17 = scalar_lea.vmem %s63_s16, 16  ;;  %s951_s18 = scalar_lea.vmem %s63_s16, 32 }
  0x1d   :  { %p948_p11 = scmp.ne.s32.totalorder %s63_s16, %s947_s17  ;;  %p952_p12 = scmp.lt.s32.totalorder %s63_s16, %s63_s16 }
  0x1e   :  { %p953_p13 = scmp.lt.s32.totalorder %s951_s18, %s947_s17 }
  0x20   :  { %p954_p0 = por %p953_p13, %p952_p12 }
  0x22   :  { %p955_p1 = pnand %p954_p0, %p948_p11 }
  0x24   :  { %958 = shalt.err (!%p955_p1)
}
  0x25   :  { %65 = dma.hbm_to_vmem [thread:$0]  %s1308_s5, 16, %s63_s16, [#allocation9]  }
  0x26   :  { %s1103_s19 = smov [#allocation11]   ;;  %s1104_s21 = smov [#allocation2]  }
  0x27   :  { %s85_s20 = sshll.u32 %s1103_s19, 4  ;;  %s26_s22 = sshll.u32 %s1104_s21, 4  ;;  %s86_s20 = int_to_ptr.vmem [resolvable:$true] %s85_s20  ;;  %s27_s22 = int_to_ptr.vmem [resolvable:$true] %s26_s22 }
  0x28   :  { %s959_s25 = scalar_lea.hbm %s1311_s8, 4096 }
  0x29   :  { %p960_p2 = scmp.ne.s32.totalorder %s1311_s8, %s959_s25  ;;  %p963_p3 = scmp.lt.u32.totalorder %s959_s25, %s1311_s8 }
  0x2b   :  { %p965_p4 = pnand %p963_p3, %p960_p2 }
  0x2d   :  { %968 = shalt.err (!%p965_p4)
}
  0x2e   :  { %s969_s5 = scalar_lea.vmem %s86_s20, 4096  ;;  %p974_p6 = scmp.lt.s32.totalorder %s86_s20, %s86_s20 }
  0x2f   :  { %p970_p5 = scmp.ne.s32.totalorder %s86_s20, %s969_s5  ;;  %p975_p7 = scmp.lt.s32.totalorder %s969_s5, %s969_s5 }
  0x31   :  { %p976_p8 = por %p975_p7, %p974_p6 }
  0x33   :  { %p977_p9 = pnand %p976_p8, %p970_p5 }
  0x35   :  { %980 = shalt.err (!%p977_p9)
}
  0x36   :  { %s1105_s16 = smov 128   ;;  %s1106_s30 = smov 8  }
  0x37   :  { %91 = dma.hbm_to_vmem [thread:$0]  %s1311_s8, 4096, %s86_s20, [#allocation12], %s1105_s16, %s1105_s16, %s1106_s30  }
  0x38   :  { %s981_s17 = scalar_lea.hbm %s1303_s0, 128 }
  0x39   :  { %p982_p10 = scmp.ne.s32.totalorder %s1303_s0, %s981_s17  ;;  %p985_p11 = scmp.lt.u32.totalorder %s981_s17, %s1303_s0 }
  0x3b   :  { %p987_p12 = pnand %p985_p11, %p982_p10 }
  0x3d   :  { %990 = shalt.err (!%p987_p12)
}
  0x3e   :  { %s991_s21 = scalar_lea.vmem %s27_s22, 128  ;;  %p996_p0 = scmp.lt.s32.totalorder %s27_s22, %s27_s22 }
  0x3f   :  { %p992_p13 = scmp.ne.s32.totalorder %s27_s22, %s991_s21  ;;  %p997_p1 = scmp.lt.s32.totalorder %s991_s21, %s991_s21 }
  0x41   :  { %p998_p2 = por %p997_p1, %p996_p0 }
  0x43   :  { %p999_p3 = pnand %p998_p2, %p992_p13 }
  0x45   :  { %1002 = shalt.err (!%p999_p3)
}
  0x46   :  { %29 = dma.hbm_to_vmem [thread:$0]  %s1303_s0, 128, %s27_s22, [#allocation3]  }
  0x47   :  { %s1107_s23 = smov [#allocation7]   ;;  %s1003_s27 = scalar_lea.hbm %s1307_s4, 512 }
  0x48   :  { %s49_s24 = sshll.u32 %s1107_s23, 4  ;;  %p1004_p4 = scmp.ne.s32.totalorder %s1307_s4, %s1003_s27  ;;  %s50_s24 = int_to_ptr.vmem [resolvable:$true] %s49_s24 }
  0x49   :  { %p1007_p5 = scmp.lt.u32.totalorder %s1003_s27, %s1307_s4 }
  0x4b   :  { %p1009_p6 = pnand %p1007_p5, %p1004_p4 }
  0x4d   :  { %1012 = shalt.err (!%p1009_p6)
}
  0x4e   :  { %s1013_s12 = scalar_lea.vmem %s50_s24, 512  ;;  %p1018_p8 = scmp.lt.s32.totalorder %s50_s24, %s50_s24 }
  0x4f   :  { %p1014_p7 = scmp.ne.s32.totalorder %s50_s24, %s1013_s12  ;;  %p1019_p9 = scmp.lt.s32.totalorder %s1013_s12, %s1013_s12 }
  0x51   :  { %p1020_p10 = por %p1019_p9, %p1018_p8 }
  0x53   :  { %p1021_p11 = pnand %p1020_p10, %p1014_p7 }
  0x55   :  { %1024 = shalt.err (!%p1021_p11)
}
  0x56   :  { %s1108_s0 = smov 64   ;;  %s1109_s22 = smov 4  }
  0x57   :  { %55 = dma.hbm_to_vmem [thread:$0]  %s1307_s4, 512, %s50_s24, [#allocation6], %s1108_s0, %s1108_s0, %s1109_s22  }
  0x58   :  { %s1110_s17 = smov [#allocation10]   ;;  %s1111_s3 = smov [#allocation13]  }
  0x59   :  { %s71_s18 = sshll.u32 %s1110_s17, 4  ;;  %s98_s14 = sshll.u32 %s1111_s3, 4  ;;  %s72_s18 = int_to_ptr.vmem [resolvable:$true] %s71_s18  ;;  %s99_s14 = int_to_ptr.vmem [resolvable:$true] %s98_s14 }
  0x5a   :  { %s1025_s8 = scalar_lea.hbm %s1309_s6, 2048 }
  0x5b   :  { %p1026_p12 = scmp.ne.s32.totalorder %s1309_s6, %s1025_s8  ;;  %p1029_p13 = scmp.lt.u32.totalorder %s1025_s8, %s1309_s6 }
  0x5d   :  { %p1031_p0 = pnand %p1029_p13, %p1026_p12 }
  0x5f   :  { %1034 = shalt.err (!%p1031_p0)
}
  0x60   :  { %s1035_s4 = scalar_lea.vmem %s72_s18, 2048  ;;  %p1040_p2 = scmp.lt.s32.totalorder %s72_s18, %s72_s18 }
  0x61   :  { %p1036_p1 = scmp.ne.s32.totalorder %s72_s18, %s1035_s4  ;;  %p1041_p3 = scmp.lt.s32.totalorder %s1035_s4, %s1035_s4 }
  0x63   :  { %p1042_p4 = por %p1041_p3, %p1040_p2 }
  0x65   :  { %p1043_p5 = pnand %p1042_p4, %p1036_p1 }
  0x67   :  { %1046 = shalt.err (!%p1043_p5)
}
  0x68   :  { %77 = dma.hbm_to_vmem [thread:$0]  %s1309_s6, 2048, %s72_s18, [#allocation9], %s1105_s16, %s1105_s16, %s1106_s30  }
  0x69   :  { %s1047_s5 = scalar_lea.hbm %s1312_s9, 32 }
  0x6a   :  { %p1048_p6 = scmp.ne.s32.totalorder %s1312_s9, %s1047_s5  ;;  %p1051_p7 = scmp.lt.u32.totalorder %s1047_s5, %s1312_s9 }
  0x6c   :  { %p1053_p8 = pnand %p1051_p7, %p1048_p6 }
  0x6e   :  { %1056 = shalt.err (!%p1053_p8)
}
  0x6f   :  { %s1057_s13 = scalar_lea.vmem %s99_s14, 32  ;;  %p1062_p10 = scmp.lt.s32.totalorder %s99_s14, %s99_s14 }
  0x70   :  { %p1058_p9 = scmp.ne.s32.totalorder %s99_s14, %s1057_s13  ;;  %p1063_p11 = scmp.lt.s32.totalorder %s1057_s13, %s1057_s13 }
  0x72   :  { %p1064_p12 = por %p1063_p11, %p1062_p10 }
  0x74   :  { %p1065_p13 = pnand %p1064_p12, %p1058_p9 }
  0x76   :  { %1068 = shalt.err (!%p1065_p13)
}
  0x77   :  { %101 = dma.hbm_to_vmem [thread:$0]  %s1312_s9, 32, %s99_s14, [#allocation12]  }
  0x78   :  { %1091 = dma.done.wait [#allocation3], 128  }
  0x79   :  { %1092 = vsyncadd [#allocation3], 4294967168 }
  0x7a   :  { %1093 = dma.done.wait [#allocation6], 528  }
  0x7b   :  { %1094 = vsyncadd [#allocation6], 4294966768 }
  0x7c   :  { %1095 = dma.done.wait [#allocation9], 2064  }
  0x7d   :  { %1096 = vsyncadd [#allocation9], 4294965232 }
  0x7e   :  { %1097 = dma.done.wait [#allocation12], 4128  }
  0x7f   :  { %1098 = vsyncadd [#allocation12], 4294963168  ;;  %v1112_v0 = vmov 0   ;;  %v124_v1 = vld [vmem:[#allocation2] sm:$0xff]  ;;  %v133_v4 = vlaneseq  ;;  %v125_v8 = vld [vmem:[%s1304_s1] sm:$0x7] }
  0x80   :  { %836 = vset.pattern.permute.xlu0 %v1112_v0  ;;  %vm127_vm0 = vcmp.ge.f32.partialorder %v124_v1, 0.5  ;;  %vm126_vm1 = vcmp.ge.f32.partialorder %v124_v1, 1.5  ;;  %v837_v10 = vld [vmem:[%s1305_s2] sm:$0xff]   ;;  %v1113_v11 = vmov 0.0   ;;  %vm1114_vm2 = vmmov 0   ;;  %v838_v13 = vld [vmem:[%s1305_s2 + $0x8] sm:$0xff]  }
  0x81   :  { %v128_v2 = vsel %vm127_vm0, 1, %v1112_v0  ;;  %v142_v3 = vsel %vm126_vm1, 1, %v1112_v0  ;;  %v134_v5 = vshrl.u32 %v133_v4, 7  ;;  %799 = vmatprep.subr.bf16.mxu0 %v1113_v11  ;;  %803 = vmatprep.mubr.msk.bf16.mxu0 %vm1114_vm2, %v1113_v11  ;;  %s1115_s1 = smov 1   ;;  %s1116_s14 = smov 127   ;;  %vm184_vm5 = vcmask 261120  }
  0x82   :  { %130 = vperm.xlu0 %836, %v128_v2   ;;  %800 = vmatpush3.bf16.msra.mxu0 %v837_v10  ;;  %v839_v23 = vld [vmem:[#allocation7] sm:$0xff]   ;;  %v840_v25 = vld [vmem:[#allocation7 + $0x8] sm:$0xff]   ;;  %v841_v26 = vld [vmem:[#allocation7 + $0x10] sm:$0xff]   ;;  %vm269_vm6 = vcmask 523264  }
  0x83   :  { %v1266_v6 = vsub.s32 1, %v134_v5  ;;  %v1268_v7 = vsub.s32 0, %v134_v5  ;;  %v149_v9 = vsub.s32 2, %v134_v5  ;;  %801 = vmatprep.subr.bf16.mxu0 %v1113_v11  ;;  %v842_v27 = vld [vmem:[#allocation7 + $0x18] sm:$0xff]   ;;  %v845_v28 = vld [vmem:[#allocation10 + $0x4] ss:$8 sps:$4 sm:$0xff]  }
  0x84   :  { %v733_v29 = vld [vmem:[#allocation5] ss:$0 sm:$0xff]  ;;  %v843_v36 = vld [vmem:[#allocation10] ss:$8 sps:$4 sm:$0xff]   ;;  %v846_v39 = vld [vmem:[#allocation10 + $0x10] ss:$8 sps:$4 sm:$0xff]  }
  0x85   :  { %v136_v14 = vrot.slane %v125_v8, %v1266_v6  ;;  %v140_v15 = vrot.slane %v125_v8, %v1268_v7  ;;  %v150_v16 = vrot.slane %v125_v8, %v149_v9  ;;  %v848_v38 = vld [vmem:[#allocation10 + $0x14] ss:$8 sps:$4 sm:$0xff]   ;;  %v851_v40 = vld [vmem:[#allocation10 + $0x24] ss:$8 sps:$4 sm:$0xff]   ;;  %v849_v41 = vld [vmem:[#allocation10 + $0x20] ss:$8 sps:$4 sm:$0xff]  }
  0x86   :  { %144 = vperm.xlu0 %836, %v142_v3   ;;  %802 = vmatpush3.bf16.msra.mxu0 %v838_v13  ;;  %v854_v42 = vld [vmem:[#allocation10 + $0x34] ss:$8 sps:$4 sm:$0xff]   ;;  %v852_v43 = vld [vmem:[#allocation10 + $0x30] ss:$8 sps:$4 sm:$0xff]   ;;  %v857_v44 = vld [vmem:[#allocation10 + $0x44] ss:$8 sps:$4 sm:$0xff]  }
  0x87   :  { %807 = vmatprep.subr.bf16.mxu0 %v1113_v11  ;;  %v855_v45 = vld [vmem:[#allocation10 + $0x40] ss:$8 sps:$4 sm:$0xff]   ;;  %v860_v46 = vld [vmem:[#allocation10 + $0x54] ss:$8 sps:$4 sm:$0xff]   ;;  %v858_v47 = vld [vmem:[#allocation10 + $0x50] ss:$8 sps:$4 sm:$0xff]  }
  0x88   :  { %v863_v48 = vld [vmem:[#allocation10 + $0x64] ss:$8 sps:$4 sm:$0xff]   ;;  %v861_v49 = vld [vmem:[#allocation10 + $0x60] ss:$8 sps:$4 sm:$0xff]   ;;  %v866_v50 = vld [vmem:[#allocation10 + $0x74] ss:$8 sps:$4 sm:$0xff]  }
  0x89   :  { %v864_v51 = vld [vmem:[#allocation10 + $0x70] ss:$8 sps:$4 sm:$0xff]   ;;  %v867_v52 = vld [vmem:[#allocation11 + $0x4] ss:$8 sps:$4 sm:$0xff]   ;;  %v869_v53 = vld [vmem:[#allocation11] ss:$8 sps:$4 sm:$0xff]  }
  0x8a   :  { %v870_v54 = vld [vmem:[#allocation11 + $0x14] ss:$8 sps:$4 sm:$0xff]   ;;  %672 = vmatprep.subr.bf16.mxu1 %v867_v52  ;;  %v872_v55 = vld [vmem:[#allocation11 + $0x10] ss:$8 sps:$4 sm:$0xff]   ;;  %v873_v56 = vld [vmem:[#allocation11 + $0x24] ss:$8 sps:$4 sm:$0xff]  }
  0x8b   :  { %673 = vmatpush1.bf16.msra.mxu1 %v869_v53  ;;  %v875_v57 = vld [vmem:[#allocation11 + $0x20] ss:$8 sps:$4 sm:$0xff]   ;;  %v876_v58 = vld [vmem:[#allocation11 + $0x34] ss:$8 sps:$4 sm:$0xff]   ;;  %v878_v59 = vld [vmem:[#allocation11 + $0x30] ss:$8 sps:$4 sm:$0xff]  }
  0x8c   :  { %674 = vmatprep.subr.bf16.mxu1 %v870_v54  ;;  %v879_v60 = vld [vmem:[#allocation11 + $0x44] ss:$8 sps:$4 sm:$0xff]   ;;  %v881_v61 = vld [vmem:[#allocation11 + $0x40] ss:$8 sps:$4 sm:$0xff]   ;;  %v882_v62 = vld [vmem:[#allocation11 + $0x54] ss:$8 sps:$4 sm:$0xff]  }
  0x8d   :  { %v884_v63 = vld [vmem:[#allocation11 + $0x50] ss:$8 sps:$4 sm:$0xff]   ;;  %v888_v2 = vld [vmem:[#allocation11 + $0x74] ss:$8 sps:$4 sm:$0xff]   ;;  %v891_v4 = vld [vmem:[#allocation11 + $0x84] ss:$8 sps:$4 sm:$0xff]  }
  0x8e   :  { %v890_v3 = vld [vmem:[#allocation11 + $0x70] ss:$8 sps:$4 sm:$0xff]   ;;  %v893_v5 = vld [vmem:[#allocation11 + $0x80] ss:$8 sps:$4 sm:$0xff]   ;;  %v894_v8 = vld [vmem:[#allocation11 + $0x94] ss:$8 sps:$4 sm:$0xff]  }
  0x8f   :  { %675 = vmatpush1.bf16.msra.mxu1 %v872_v55  ;;  %v896_v9 = vld [vmem:[#allocation11 + $0x90] ss:$8 sps:$4 sm:$0xff]   ;;  %v897_v10 = vld [vmem:[#allocation11 + $0xa4] ss:$8 sps:$4 sm:$0xff]  }
  0x90   :  { %676 = vmatprep.subr.bf16.mxu1 %v873_v56  ;;  %v902_v13 = vld [vmem:[#allocation11 + $0xb0] ss:$8 sps:$4 sm:$0xff]  }
  0x93   :  { %677 = vmatpush1.bf16.msra.mxu1 %v875_v57 }
  0x94   :  { %678 = vmatprep.subr.bf16.mxu1 %v876_v58 }
  0x97   :  { %679 = vmatpush1.bf16.msra.mxu1 %v878_v59 }
  0x98   :  { %680 = vmatprep.subr.bf16.mxu1 %v879_v60 }
  0x9b   :  { %681 = vmatpush1.bf16.msra.mxu1 %v881_v61 }
  0x9c   :  { %682 = vmatprep.subr.bf16.mxu1 %v882_v62 }
  0x9f   :  { %683 = vmatpush1.bf16.msra.mxu1 %v884_v63 }
 0x101   :  { %v131_v12 = vpop.permute.xlu0 %130 }
 0x102   :  { %vm132_vm3 = vcmp.eq.s32.totalorder %v131_v12, 1  ;;  %v900_v12 = vld [vmem:[#allocation11 + $0xb4] ss:$8 sps:$4 sm:$0xff]  }
 0x103   :  { %v141_v18 = vsel %vm132_vm3, %v136_v14, %v140_v15  ;;  %v903_v14 = vld [vmem:[#allocation11 + $0xc4] ss:$8 sps:$4 sm:$0xff]   ;;  %v905_v15 = vld [vmem:[#allocation11 + $0xc0] ss:$8 sps:$4 sm:$0xff]  }
 0x105   :  { %v145_v17 = vpop.permute.xlu0 %144 }
 0x106   :  { %vm146_vm4 = vcmp.eq.s32.totalorder %v145_v17, 1  ;;  %v908_v17 = vld [vmem:[#allocation11 + $0xd0] ss:$8 sps:$4 sm:$0xff]  }
 0x107   :  { %v151_v19 = vsel %vm146_vm4, %v150_v16, %v141_v18  ;;  %v906_v16 = vld [vmem:[#allocation11 + $0xd4] ss:$8 sps:$4 sm:$0xff]  }
 0x108   :  { %153 = vrot.lane.b32.xlu1 %v151_v19, %s1115_s1  ;;  %v737_v18 = vld [vmem:[#allocation8] ss:$0 sm:$0xff] }
 0x17a   :  { %v154_v20 = vpop.permute.xlu1 %153 }
 0x17b   :  { %v156_v21 = vadd.f32 %v154_v20, %v124_v1  ;;  %v887_v1 = vld [vmem:[#allocation11 + $0x60] ss:$8 sps:$4 sm:$0xff]  }
 0x17d   :  { %v157_v22 = vpack.c.bf16 %v156_v21, %v156_v21 }
 0x17f   :  { %170 = vrot.lane.b32.xlu1 %v157_v22, %s1116_s14 }
 0x1f1   :  { %v171_v24 = vpop.permute.xlu1 %170 }
 0x1f2   :  { %804 = vmatmul.mubr.msk.bf16.vlgmr.msra.gmra.mrb[0].mxu0 %vm184_vm5, %v171_v24 }
 0x1f3   :  { %808 = vmatpush3.bf16.msra.mxu0 %v839_v23  ;;  %815 = vmatprep.mubr.msk.bf16.mxu0 %vm1114_vm2, %v1113_v11 }
 0x1f4   :  { %809 = vmatprep.subr.bf16.mxu0 %v1113_v11 }
 0x1f7   :  { %810 = vmatpush3.bf16.msra.mxu0 %v840_v25 }
 0x1f8   :  { %811 = vmatprep.subr.bf16.mxu0 %v1113_v11 }
 0x1fb   :  { %812 = vmatpush3.bf16.msra.mxu0 %v841_v26  ;;  %v909_v26 = vld [vmem:[#allocation11 + $0xe4] ss:$8 sps:$4 sm:$0xff]  }
 0x1fc   :  { %813 = vmatprep.subr.bf16.mxu0 %v1113_v11  ;;  %v899_v11 = vld [vmem:[#allocation11 + $0xa0] ss:$8 sps:$4 sm:$0xff]  }
 0x1ff   :  { %814 = vmatpush3.bf16.msra.mxu0 %v842_v27  ;;  %v911_v27 = vld [vmem:[#allocation11 + $0xe0] ss:$8 sps:$4 sm:$0xff]  }
 0x200   :  { %423 = vmatprep.subr.bf16.mxu0 %v845_v28  ;;  %v912_v28 = vld [vmem:[#allocation11 + $0xf4] ss:$8 sps:$4 sm:$0xff]  }
 0x2c5   :  { %v222_v30 = vpop.f32.mrb[0].mxu0 }
 0x2c6   :  { %v223_v31 = vadd.f32 %v733_v29, %v222_v30  ;;  %v805_v32 = vpop.f32.mrb[1].mxu0  ;;  %v914_v29 = vld [vmem:[#allocation11 + $0xf0] ss:$8 sps:$4 sm:$0xff]   ;;  %v331_v30 = vld [vmem:[%s1310_s7] sm:$0x3]  ;;  %s1117_s7 = smov [#allocation14]  }
 0x2c7   :  { %v225_v33 = vpop.f32.mrb[2].mxu0  ;;  %v340_v32 = vrot.slane %v331_v30, %v1266_v6  ;;  %s721_s21 = sshll.u32 %s1117_s7, 4  ;;  %s722_s21 = int_to_ptr.vmem [resolvable:$true] %s721_s21 }
 0x2c8   :  { %v228_v34 = vmax.f32 %v223_v31, 0.0  ;;  %v806_v35 = vpop.f32.mrb[3].mxu0  ;;  %v336_v31 = vrot.slane %v331_v30, %v1268_v7  ;;  %s1069_s8 = scalar_lea.vmem %s722_s21, 256  ;;  %p1074_p1 = scmp.lt.s32.totalorder %s722_s21, %s722_s21 }
 0x2c9   :  { %p1070_p0 = scmp.ne.s32.totalorder %s722_s21, %s1069_s8  ;;  %p1075_p2 = scmp.lt.s32.totalorder %s1069_s8, %s1069_s8 }
 0x2ca   :  { %v229_v37 = vpack.c.bf16 %v228_v34, %v228_v34 }
 0x2cb   :  { %p1076_p3 = por %p1075_p2, %p1074_p1 }
 0x2cc   :  { %816 = vmatmul.mubr.msk.bf16.vlgmr.msra.gmra.mrb[4].mxu0 %vm269_vm6, %v229_v37 }
 0x2cd   :  { %424 = vmatpush1.bf16.msra.mxu0 %v843_v36  ;;  %455 = vmatprep.mubr.bf16.mxu0 %v1112_v0  ;;  %v885_v0 = vld [vmem:[#allocation11 + $0x64] ss:$8 sps:$4 sm:$0xff]   ;;  %p1077_p4 = pnand %p1076_p3, %p1070_p0 }
 0x2ce   :  { %425 = vmatprep.subr.bf16.mxu0 %v848_v38  ;;  %684 = vmatprep.subr.bf16.mxu1 %v885_v0 }
 0x2cf   :  { %685 = vmatpush1.bf16.msra.mxu1 %v887_v1 }
 0x2d0   :  { %686 = vmatprep.subr.bf16.mxu1 %v888_v2 }
 0x2d1   :  { %426 = vmatpush1.bf16.msra.mxu0 %v846_v39 }
 0x2d2   :  { %427 = vmatprep.subr.bf16.mxu0 %v851_v40 }
 0x2d3   :  { %687 = vmatpush1.bf16.msra.mxu1 %v890_v3 }
 0x2d4   :  { %688 = vmatprep.subr.bf16.mxu1 %v891_v4 }
 0x2d5   :  { %428 = vmatpush1.bf16.msra.mxu0 %v849_v41 }
 0x2d6   :  { %429 = vmatprep.subr.bf16.mxu0 %v854_v42 }
 0x2d7   :  { %689 = vmatpush1.bf16.msra.mxu1 %v893_v5 }
 0x2d8   :  { %690 = vmatprep.subr.bf16.mxu1 %v894_v8 }
 0x2d9   :  { %430 = vmatpush1.bf16.msra.mxu0 %v852_v43  ;;  %v500_v43 = vld [vmem:[#allocation13] sm:$0x3] }
 0x2da   :  { %431 = vmatprep.subr.bf16.mxu0 %v857_v44  ;;  %v505_v44 = vrot.slane %v500_v43, %v1268_v7 }
 0x2db   :  { %691 = vmatpush1.bf16.msra.mxu1 %v896_v9 }
 0x2dc   :  { %692 = vmatprep.subr.bf16.mxu1 %v897_v10 }
 0x2dd   :  { %432 = vmatpush1.bf16.msra.mxu0 %v855_v45  ;;  %v509_v45 = vrot.slane %v500_v43, %v1266_v6 }
 0x2de   :  { %433 = vmatprep.subr.bf16.mxu0 %v860_v46 }
 0x2df   :  { %693 = vmatpush1.bf16.msra.mxu1 %v899_v11 }
 0x2e0   :  { %694 = vmatprep.subr.bf16.mxu1 %v900_v12 }
 0x2e1   :  { %434 = vmatpush1.bf16.msra.mxu0 %v858_v47 }
 0x2e2   :  { %435 = vmatprep.subr.bf16.mxu0 %v863_v48 }
 0x2e3   :  { %695 = vmatpush1.bf16.msra.mxu1 %v902_v13 }
 0x2e4   :  { %696 = vmatprep.subr.bf16.mxu1 %v903_v14 }
 0x2e5   :  { %436 = vmatpush1.bf16.msra.mxu0 %v861_v49 }
 0x2e6   :  { %437 = vmatprep.subr.bf16.mxu0 %v866_v50 }
 0x2e7   :  { %697 = vmatpush1.bf16.msra.mxu1 %v905_v15 }
 0x2e8   :  { %698 = vmatprep.subr.bf16.mxu1 %v906_v16 }
 0x2e9   :  { %438 = vmatpush1.bf16.msra.mxu0 %v864_v51 }
 0x2eb   :  { %699 = vmatpush1.bf16.msra.mxu1 %v908_v17 }
 0x2ec   :  { %700 = vmatprep.subr.bf16.mxu1 %v909_v26 }
 0x2ef   :  { %701 = vmatpush1.bf16.msra.mxu1 %v911_v27 }
 0x2f0   :  { %702 = vmatprep.subr.bf16.mxu1 %v912_v28 }
 0x2f3   :  { %703 = vmatpush1.bf16.msra.mxu1 %v914_v29 }
 0x39f   :  { %v307_v19 = vpop.f32.mrb[4].mxu0 }
 0x3a0   :  { %v308_v20 = vadd.f32 %v737_v18, %v307_v19  ;;  %v817_v21 = vpop.f32.mrb[5].mxu0 }
 0x3a1   :  { %v310_v22 = vpop.f32.mrb[6].mxu0 }
 0x3a2   :  { %v313_v23 = vmax.f32 %v308_v20, 0.0  ;;  %v818_v24 = vpop.f32.mrb[7].mxu0 }
 0x3a4   :  { %v314_v25 = vpack.c.bf16 %v313_v23, %v313_v23 }
 0x3a6   :  { %456 = vmatmul.mubr.bf16.vlgmr.msra.gmra.mrb[8].mxu0 %v314_v25 }
 0x479   :  { %v457_v33 = vpop.f32.mrb[8].mxu0 }
 0x47a   :  { %v458_v34 = vadd.f32 %v457_v33, %v336_v31  ;;  %v459_v35 = vpop.f32.mrb[9].mxu0 }
 0x47b   :  { %v460_v36 = vadd.f32 %v459_v35, %v340_v32  ;;  %v461_v37 = vpop.f32.mrb[10].mxu0 }
 0x47c   :  { %v464_v38 = vmax.f32 %v458_v34, 0.0  ;;  %v462_v39 = vpop.f32.mrb[11].mxu0 }
 0x47d   :  { %v465_v40 = vmax.f32 %v460_v36, 0.0 }
 0x47e   :  { %v466_v42 = vpack.c.bf16 %v464_v38, %v464_v38 }
 0x47f   :  { %v467_v41 = vpack.c.bf16 %v465_v40, %v465_v40 }
 0x481   :  { %704 = vmatprep.mubr.bf16.mxu1 %v467_v41 }
 0x482   :  { %705 = vmatmul.mubr.bf16.vlgmr.msra.gmra.mrb[0].mxu1 %v466_v42 }
 0x555   :  { %v706_v46 = vpop.f32.mrb[0].mxu1 }
 0x556   :  { %v707_v47 = vadd.f32 %v706_v46, %v505_v44  ;;  %v708_v48 = vpop.f32.mrb[1].mxu1 }
 0x557   :  { %v709_v49 = vadd.f32 %v708_v48, %v509_v45  ;;  %v710_v50 = vpop.f32.mrb[2].mxu1 }
 0x558   :  { %713 = vst [vmem:[#allocation14] sm:$0xff] %v707_v47  ;;  %v711_v51 = vpop.f32.mrb[3].mxu1 }
 0x559   :  { %714 = vst [vmem:[#allocation14 + $0x8] sm:$0xff] %v709_v49 }
 0x55a   :  { %1080 = shalt.err (!%p1077_p4)
}
 0x55b   :  { %s1081_s25 = scalar_lea.hbm %s1313_s10, 256 }
 0x55c   :  { %p1082_p5 = scmp.ne.s32.totalorder %s1313_s10, %s1081_s25  ;;  %p1085_p6 = scmp.lt.u32.totalorder %s1081_s25, %s1313_s10 }
 0x55e   :  { %p1087_p7 = pnand %p1085_p6, %p1082_p5 }
 0x560   :  { %1090 = shalt.err (!%p1087_p7)
}
 0x561   :  { %724 = dma.vmem_to_hbm [thread:$0]  %s722_s21, 256, %s1313_s10, [#allocation4]  }
 0x562   :  { %1099 = dma.done.wait [#allocation4], 256  }
 0x563   :  { %1100 = vsyncadd [#allocation4], 4294967040 }
 0x564   :  { %728 = vsyncpa [#allocation3], 1 }
 0x565   :  { %729 = vsyncpa [#allocation6], 1 }
 0x566   :  { %730 = vsyncpa [#allocation9], 1 }
 0x567   :  { %731 = vsyncpa [#allocation12], 1 }
 0x568   :  { %732 = vsyncpa [#allocation4], 1 }

</bundles_post_ra>
